<compile_context>
chip_gen: v5e
topology: v5e:2x2
jax: 0.10.0
libtpu: 0.0.40
codegen_flags: <defaults>
</compile_context>

<pallas_src>
import functools

import jax
import jax.numpy as jnp
from jax.experimental import pallas as pl
from jax.experimental.pallas import tpu as pltpu


# --------------------------------------------------------------------------- #
# fused kernel: conv -> global BN stats (phase 0) -> affine + act (phase 1)
# --------------------------------------------------------------------------- #
def _conv_bn_act_kernel(p_ref, w_ref, g_ref, b_ref, o_ref,
                        mean_ref, m2_ref, scale_ref, bias_ref,
                        *, block_n, m, eps, act, total_samples):
    phase = pl.program_id(0)          # 0 = stats pass, 1 = normalize pass
    bidx = pl.program_id(1)           # batch-block index
    blk_samples = float(block_n * m)

    w = w_ref[...]                    # [Cout, K]
    # Conv for every image of this batch block: one deep [Cout,K]x[K,M] MXU
    # matmul per image, f32 accumulation.  Recomputed in phase 1 (far cheaper
    # than an HBM round trip of the f32 intermediate).
    accs = [jnp.dot(w, p_ref[i], preferred_element_type=jnp.float32)
            for i in range(block_n)]                          # each [Cout, M]

    # ------------------ phase 0: accumulate global BN statistics ------------
    @pl.when(phase == 0)
    def _():
        @pl.when(bidx == 0)
        def _():
            mean_ref[...] = jnp.zeros_like(mean_ref)
            m2_ref[...] = jnp.zeros_like(m2_ref)

        blk_sum = accs[0].sum(axis=1, keepdims=True)          # [Cout, 1]
        for a in accs[1:]:
            blk_sum = blk_sum + a.sum(axis=1, keepdims=True)
        blk_mean = blk_sum * (1.0 / blk_samples)
        blk_m2 = jnp.zeros_like(blk_mean)
        for a in accs:                                        # centered: stable
            c = a - blk_mean
            blk_m2 = blk_m2 + (c * c).sum(axis=1, keepdims=True)

        # Chan parallel-variance merge of this block into the running stats.
        n_run = bidx.astype(jnp.float32) * blk_samples
        n_tot = n_run + blk_samples
        delta = blk_mean - mean_ref[...]
        mean_ref[...] = mean_ref[...] + delta * (blk_samples / n_tot)
        m2_ref[...] = (m2_ref[...] + blk_m2
                       + delta * delta * (n_run * blk_samples / n_tot))

    # ------------------ phase 1: folded BN affine + activation --------------
    @pl.when(phase == 1)
    def _():
        @pl.when(bidx == 0)
        def _():
            var = m2_ref[...] * (1.0 / total_samples)         # biased batch var
            inv = jax.lax.rsqrt(var + eps)
            scale_ref[...] = g_ref[...] * inv
            bias_ref[...] = b_ref[...] - mean_ref[...] * g_ref[...] * inv

        scale = scale_ref[...]                                # [Cout, 1]
        bias = bias_ref[...]
        for i in range(block_n):
            y = accs[i] * scale + bias
            if act == "relu":
                y = jnp.maximum(y, 0.0)
            elif callable(act):
                y = act(y)
            o_ref[i] = y.astype(o_ref.dtype)


# --------------------------------------------------------------------------- #
# wrapper
# --------------------------------------------------------------------------- #
def _vmem_capacity_bytes():
    try:
        return int(pltpu.get_tpu_info().vmem_capacity_bytes)
    except Exception:
        return 64 << 20          # conservative: v7x per-TensorCore VMEM


def _pick_block_n(n, per_image_bytes, budget_bytes):
    """Largest divisor of n whose double-buffered working set fits the budget."""
    best = 1
    for b in range(1, n + 1):
        if n % b == 0 and 2 * b * per_image_bytes <= budget_bytes:
            best = b
    return best


def conv_block(x_nchw, weight_oihw, gamma, beta, *,
               stride=1, padding=0, eps=1e-5, act=None):
    """Forward pass of ConvBlock.  x_nchw: [N, Cin, H, W] (PyTorch layout).

    Conv2d(has_bias=False default; a conv bias would be cancelled by the BN
    mean subtraction anyway) -> BatchNorm2d with training batch statistics
    -> optional activation.
    """
    n, cin, h, w = x_nchw.shape
    cout, cin_w, kh, kw = weight_oihw.shape
    assert cin == cin_w
    ho = (h + 2 * padding - kh) // stride + 1
    wo = (w + 2 * padding - kw) // stride + 1
    m = ho * wo
    k = cin * kh * kw

    # Wrapper-side im2col: a single XLA op that also performs the zero padding
    # and yields a lane-dense [N, K, Ho*Wo] patch tensor.  Its feature order is
    # channel-major / tap-minor, which matches a plain OIHW reshape of the
    # weights (no transposes anywhere).
    patches = jax.lax.conv_general_dilated_patches(
        x_nchw, (kh, kw), (stride, stride),
        [(padding, padding), (padding, padding)],
        dimension_numbers=("NCHW", "OIHW", "NCHW"),
    ).reshape(n, k, m)
    wmat = weight_oihw.reshape(cout, k)
    gamma2 = gamma.astype(jnp.float32).reshape(cout, 1)
    beta2 = beta.astype(jnp.float32).reshape(cout, 1)

    out_dtype = x_nchw.dtype
    per_image = (k * m * patches.dtype.itemsize
                 + cout * m * jnp.dtype(out_dtype).itemsize)

    vmem_cap = _vmem_capacity_bytes()
    ws_budget = max(vmem_cap // 2 - (8 << 20), 8 << 20)
    block_n = _pick_block_n(n, per_image, ws_budget)
    # TODO(synk): if a single image's patches ever exceed the VMEM budget,
    # also tile the K / M axes (not needed at ConvBlock-sized problems).
    nb = n // block_n
    total_samples = float(n * m)

    fixed_bytes = cout * k * wmat.dtype.itemsize + 4 * cout * 4
    vmem_limit = int(min(max(2 * block_n * per_image + fixed_bytes + (8 << 20),
                             16 << 20),
                         vmem_cap - (8 << 20)))

    kernel = functools.partial(
        _conv_bn_act_kernel, block_n=block_n, m=m, eps=eps, act=act,
        total_samples=total_samples)

    out_flat = pl.pallas_call(
        kernel,
        out_shape=jax.ShapeDtypeStruct((n, cout, m), out_dtype),
        grid=(2, nb),                                   # (phase, batch block)
        in_specs=[
            pl.BlockSpec((block_n, k, m), lambda p, b: (b, 0, 0)),
            pl.BlockSpec((cout, k), lambda p, b: (0, 0)),
            pl.BlockSpec((cout, 1), lambda p, b: (0, 0)),
            pl.BlockSpec((cout, 1), lambda p, b: (0, 0)),
        ],
        # Phase 0 never writes the output; pinning its block index at 0 means
        # no garbage block is ever flushed and every block is written back
        # exactly once with its phase-1 contents.
        out_specs=pl.BlockSpec((block_n, cout, m), lambda p, b: (b * p, 0, 0)),
        scratch_shapes=[
            pltpu.VMEM((cout, 1), jnp.float32),   # running mean
            pltpu.VMEM((cout, 1), jnp.float32),   # running centered M2
            pltpu.VMEM((cout, 1), jnp.float32),   # folded scale
            pltpu.VMEM((cout, 1), jnp.float32),   # folded bias
        ],
        compiler_params=pltpu.CompilerParams(
            dimension_semantics=("arbitrary", "arbitrary"),
            vmem_limit_bytes=vmem_limit,
        ),
    )(patches, wmat, gamma2, beta2)

    # TODO(synk): BatchNorm2d running_mean/running_var buffers are not updated
    # (stateful side effect; the training-mode forward output never uses them).
    # [N, Cout, Ho*Wo] -> [N, Cout, Ho, Wo]: contiguous reshape, no transpose.
    return out_flat.reshape(n, cout, ho, wo)


# --------------------------------------------------------------------------- #
# reference + test
# --------------------------------------------------------------------------- #
def _reference(x_nchw, weight_oihw, gamma, beta, *, stride, padding, eps, act):
    y = jax.lax.conv_general_dilated(
        x_nchw, weight_oihw, (stride, stride),
        [(padding, padding), (padding, padding)],
        dimension_numbers=("NCHW", "OIHW", "NCHW"))
    mu = jnp.mean(y, axis=(0, 2, 3), keepdims=True)
    var = jnp.mean((y - mu) ** 2, axis=(0, 2, 3), keepdims=True)   # biased
    y = (y - mu) / jnp.sqrt(var + eps)
    y = y * gamma.reshape(1, -1, 1, 1) + beta.reshape(1, -1, 1, 1)
    if act == "relu":
        y = jnp.maximum(y, 0.0)
    return y


if __name__ == "__main__":
    # ConvBlock(in_chnls=4, out_chnls=8, kernel_size=3, stride=1, padding=1,
    #           has_bias=False, act=relu)
    N, CIN, H, W = 2, 4, 16, 16
    COUT, K = 8, 3
    STRIDE, PAD = 1, 1

    key = jax.random.PRNGKey(0)
    kx, kw_, kg, kb = jax.random.split(key, 4)
    x = jax.random.normal(kx, (N, CIN, H, W), dtype=jnp.float32)
    weight = 0.1 * jax.random.normal(kw_, (COUT, CIN, K, K), dtype=jnp.float32)
    gamma = 1.0 + 0.1 * jax.random.normal(kg, (COUT,), dtype=jnp.float32)
    beta = 0.1 * jax.random.normal(kb, (COUT,), dtype=jnp.float32)

    fwd = jax.jit(functools.partial(conv_block, stride=STRIDE, padding=PAD,
                                    eps=1e-5, act="relu"))
    out = fwd(x, weight, gamma, beta)
    out = jax.block_until_ready(out)

    ref = _reference(x, weight, gamma, beta,
                     stride=STRIDE, padding=PAD, eps=1e-5, act="relu")
    assert out.shape == (N, COUT, H, W)
    assert jnp.allclose(out, ref, rtol=2e-3, atol=2e-3), \
        f"max abs diff {jnp.max(jnp.abs(out - ref))}"
    print("KERNEL_OK")
</pallas_src>

<mosaic_0001>
module attributes {stable_mosaic.version = 11 : i64} {
  func.func @_conv_bn_act_kernel(%arg0: i32, %arg1: i32, %arg2: memref<2x36x256xf32, #tpu.memory_space<vmem>>, %arg3: memref<8x36xf32, #tpu.memory_space<vmem>>, %arg4: memref<8x1xf32, #tpu.memory_space<vmem>>, %arg5: memref<8x1xf32, #tpu.memory_space<vmem>>, %arg6: memref<2x8x256xf32, #tpu.memory_space<vmem>>, %arg7: memref<8x1xf32, #tpu.memory_space<vmem>>, %arg8: memref<8x1xf32, #tpu.memory_space<vmem>>, %arg9: memref<8x1xf32, #tpu.memory_space<vmem>>, %arg10: memref<8x1xf32, #tpu.memory_space<vmem>>) attributes {dimension_semantics = [#tpu.dimension_semantics<arbitrary>, #tpu.dimension_semantics<arbitrary>], iteration_bounds = array<i64: 2, 1>, scalar_prefetch = 0 : i64, scratch_operands = 4 : i64, tpu.core_type = #tpu.core_type<tc>, window_params = [{transform_indices = @transform_0, window_bounds = array<i64: 2, 36, 256>}, {pipeline_mode = #tpu.pipeline_mode<synchronous>, transform_indices = @transform_1, window_bounds = array<i64: 8, 36>}, {pipeline_mode = #tpu.pipeline_mode<synchronous>, transform_indices = @transform_2, window_bounds = array<i64: 8, 1>}, {pipeline_mode = #tpu.pipeline_mode<synchronous>, transform_indices = @transform_3, window_bounds = array<i64: 8, 1>}, {transform_indices = @transform_4, window_bounds = array<i64: 2, 8, 256>}]} {
    %c0 = arith.constant 0 : index
    %c0_0 = arith.constant 0 : index
    %0 = vector.load %arg3[%c0, %c0_0] : memref<8x36xf32, #tpu.memory_space<vmem>>, vector<8x36xf32>
    %c0_1 = arith.constant 0 : index
    %c0_2 = arith.constant 0 : index
    %c0_3 = arith.constant 0 : index
    %1 = vector.load %arg2[%c0_1, %c0_2, %c0_3] : memref<2x36x256xf32, #tpu.memory_space<vmem>>, vector<1x36x256xf32>
    %2 = vector.shape_cast %1 : vector<1x36x256xf32> to vector<36x256xf32>
    %cst = arith.constant dense<0.000000e+00> : vector<8x256xf32>
    %3 = tpu.matmul %0, %2, %cst {dimension_numbers = #tpu.dot_dimension_numbers<[1], [0], [0], [1], [0, 0, 1, 1], [], []>} : vector<8x36xf32>, vector<36x256xf32>, vector<8x256xf32> -> vector<8x256xf32>
    %c1 = arith.constant 1 : index
    %c0_4 = arith.constant 0 : index
    %c0_5 = arith.constant 0 : index
    %4 = vector.load %arg2[%c1, %c0_4, %c0_5] : memref<2x36x256xf32, #tpu.memory_space<vmem>>, vector<1x36x256xf32>
    %5 = vector.shape_cast %4 : vector<1x36x256xf32> to vector<36x256xf32>
    %cst_6 = arith.constant dense<0.000000e+00> : vector<8x256xf32>
    %6 = tpu.matmul %0, %5, %cst_6 {dimension_numbers = #tpu.dot_dimension_numbers<[1], [0], [0], [1], [0, 0, 1, 1], [], []>} : vector<8x36xf32>, vector<36x256xf32>, vector<8x256xf32> -> vector<8x256xf32>
    %c0_i32 = arith.constant 0 : i32
    %7 = arith.cmpi eq, %arg0, %c0_i32 : i32
    %8 = arith.extui %7 : i1 to i32
    %c0_i32_7 = arith.constant 0 : i32
    %9 = arith.cmpi ne, %8, %c0_i32_7 : i32
    scf.if %9 {
      %c0_i32_9 = arith.constant 0 : i32
      %13 = arith.cmpi eq, %arg1, %c0_i32_9 : i32
      %14 = arith.extui %13 : i1 to i32
      %c0_i32_10 = arith.constant 0 : i32
      %15 = arith.cmpi ne, %14, %c0_i32_10 : i32
      scf.if %15 {
        %cst_31 = arith.constant 0.000000e+00 : f32
        %56 = vector.broadcast %cst_31 : f32 to vector<8x1xf32>
        %c0_32 = arith.constant 0 : index
        %c0_33 = arith.constant 0 : index
        %57 = vector.load %arg7[%c0_32, %c0_33] : memref<8x1xf32, #tpu.memory_space<vmem>>, vector<8x1xf32>
        tpu.vector_store %arg7[%c0_32, %c0_33], %56 {strides = array<i32>} : memref<8x1xf32, #tpu.memory_space<vmem>>, vector<8x1xf32>,
        %cst_34 = arith.constant 0.000000e+00 : f32
        %58 = vector.broadcast %cst_34 : f32 to vector<8x1xf32>
        %c0_35 = arith.constant 0 : index
        %c0_36 = arith.constant 0 : index
        %59 = vector.load %arg8[%c0_35, %c0_36] : memref<8x1xf32, #tpu.memory_space<vmem>>, vector<8x1xf32>
        tpu.vector_store %arg8[%c0_35, %c0_36], %58 {strides = array<i32>} : memref<8x1xf32, #tpu.memory_space<vmem>>, vector<8x1xf32>,
      } else {
      }
      %cst_11 = arith.constant dense<0.000000e+00> : vector<8xf32>
      %16 = vector.multi_reduction <add>, %3, %cst_11 [1] : vector<8x256xf32> to vector<8xf32>
      %17 = vector.shape_cast %16 : vector<8xf32> to vector<8x1xf32>
      %cst_12 = arith.constant dense<0.000000e+00> : vector<8xf32>
      %18 = vector.multi_reduction <add>, %6, %cst_12 [1] : vector<8x256xf32> to vector<8xf32>
      %19 = vector.shape_cast %18 : vector<8xf32> to vector<8x1xf32>
      %20 = arith.addf %17, %19 : vector<8x1xf32>
      %cst_13 = arith.constant 0.001953125 : f32
      %21 = vector.broadcast %cst_13 : f32 to vector<8x1xf32>
      %22 = arith.mulf %20, %21 : vector<8x1xf32>
      %cst_14 = arith.constant 0.000000e+00 : f32
      %23 = vector.broadcast %cst_14 : f32 to vector<8x1xf32>
      %24 = vector.broadcast %22 : vector<8x1xf32> to vector<8x256xf32>
      %25 = arith.subf %3, %24 : vector<8x256xf32>
      %26 = arith.mulf %25, %25 : vector<8x256xf32>
      %cst_15 = arith.constant dense<0.000000e+00> : vector<8xf32>
      %27 = vector.multi_reduction <add>, %26, %cst_15 [1] : vector<8x256xf32> to vector<8xf32>
      %28 = vector.shape_cast %27 : vector<8xf32> to vector<8x1xf32>
      %29 = arith.addf %23, %28 : vector<8x1xf32>
      %30 = vector.broadcast %22 : vector<8x1xf32> to vector<8x256xf32>
      %31 = arith.subf %6, %30 : vector<8x256xf32>
      %32 = arith.mulf %31, %31 : vector<8x256xf32>
      %cst_16 = arith.constant dense<0.000000e+00> : vector<8xf32>
      %33 = vector.multi_reduction <add>, %32, %cst_16 [1] : vector<8x256xf32> to vector<8xf32>
      %34 = vector.shape_cast %33 : vector<8xf32> to vector<8x1xf32>
      %35 = arith.addf %29, %34 : vector<8x1xf32>
      %36 = arith.sitofp %arg1 : i32 to f32
      %cst_17 = arith.constant 5.120000e+02 : f32
      %37 = arith.mulf %36, %cst_17 : f32
      %cst_18 = arith.constant 5.120000e+02 : f32
      %38 = arith.addf %37, %cst_18 : f32
      %c0_19 = arith.constant 0 : index
      %c0_20 = arith.constant 0 : index
      %39 = vector.load %arg7[%c0_19, %c0_20] : memref<8x1xf32, #tpu.memory_space<vmem>>, vector<8x1xf32>
      %40 = arith.subf %22, %39 : vector<8x1xf32>
      %c0_21 = arith.constant 0 : index
      %c0_22 = arith.constant 0 : index
      %41 = vector.load %arg7[%c0_21, %c0_22] : memref<8x1xf32, #tpu.memory_space<vmem>>, vector<8x1xf32>
      %cst_23 = arith.constant 5.120000e+02 : f32
      %42 = arith.divf %cst_23, %38 : f32
      %43 = vector.broadcast %42 : f32 to vector<8x1xf32>
      %44 = arith.mulf %40, %43 : vector<8x1xf32>
      %45 = arith.addf %41, %44 : vector<8x1xf32>
      %c0_24 = arith.constant 0 : index
      %c0_25 = arith.constant 0 : index
      %46 = vector.load %arg7[%c0_24, %c0_25] : memref<8x1xf32, #tpu.memory_space<vmem>>, vector<8x1xf32>
      tpu.vector_store %arg7[%c0_24, %c0_25], %45 {strides = array<i32>} : memref<8x1xf32, #tpu.memory_space<vmem>>, vector<8x1xf32>,
      %c0_26 = arith.constant 0 : index
      %c0_27 = arith.constant 0 : index
      %47 = vector.load %arg8[%c0_26, %c0_27] : memref<8x1xf32, #tpu.memory_space<vmem>>, vector<8x1xf32>
      %48 = arith.addf %47, %35 : vector<8x1xf32>
      %49 = arith.mulf %40, %40 : vector<8x1xf32>
      %cst_28 = arith.constant 5.120000e+02 : f32
      %50 = arith.mulf %37, %cst_28 : f32
      %51 = arith.divf %50, %38 : f32
      %52 = vector.broadcast %51 : f32 to vector<8x1xf32>
      %53 = arith.mulf %49, %52 : vector<8x1xf32>
      %54 = arith.addf %48, %53 : vector<8x1xf32>
      %c0_29 = arith.constant 0 : index
      %c0_30 = arith.constant 0 : index
      %55 = vector.load %arg8[%c0_29, %c0_30] : memref<8x1xf32, #tpu.memory_space<vmem>>, vector<8x1xf32>
      tpu.vector_store %arg8[%c0_29, %c0_30], %54 {strides = array<i32>} : memref<8x1xf32, #tpu.memory_space<vmem>>, vector<8x1xf32>,
    } else {
    }
    %c1_i32 = arith.constant 1 : i32
    %10 = arith.cmpi eq, %arg0, %c1_i32 : i32
    %11 = arith.extui %10 : i1 to i32
    %c0_i32_8 = arith.constant 0 : i32
    %12 = arith.cmpi ne, %11, %c0_i32_8 : i32
    scf.if %12 {
      %c0_i32_9 = arith.constant 0 : i32
      %13 = arith.cmpi eq, %arg1, %c0_i32_9 : i32
      %14 = arith.extui %13 : i1 to i32
      %c0_i32_10 = arith.constant 0 : i32
      %15 = arith.cmpi ne, %14, %c0_i32_10 : i32
      scf.if %15 {
        %c0_23 = arith.constant 0 : index
        %c0_24 = arith.constant 0 : index
        %36 = vector.load %arg8[%c0_23, %c0_24] : memref<8x1xf32, #tpu.memory_space<vmem>>, vector<8x1xf32>
        %cst_25 = arith.constant 0.001953125 : f32
        %37 = vector.broadcast %cst_25 : f32 to vector<8x1xf32>
        %38 = arith.mulf %36, %37 : vector<8x1xf32>
        %cst_26 = arith.constant 9.99999974E-6 : f32
        %39 = vector.broadcast %cst_26 : f32 to vector<8x1xf32>
        %40 = arith.addf %38, %39 : vector<8x1xf32>
        %41 = math.rsqrt %40 : vector<8x1xf32>
        %c0_27 = arith.constant 0 : index
        %c0_28 = arith.constant 0 : index
        %42 = vector.load %arg4[%c0_27, %c0_28] : memref<8x1xf32, #tpu.memory_space<vmem>>, vector<8x1xf32>
        %43 = arith.mulf %42, %41 : vector<8x1xf32>
        %c0_29 = arith.constant 0 : index
        %c0_30 = arith.constant 0 : index
        %44 = vector.load %arg9[%c0_29, %c0_30] : memref<8x1xf32, #tpu.memory_space<vmem>>, vector<8x1xf32>
        tpu.vector_store %arg9[%c0_29, %c0_30], %43 {strides = array<i32>} : memref<8x1xf32, #tpu.memory_space<vmem>>, vector<8x1xf32>,
        %c0_31 = arith.constant 0 : index
        %c0_32 = arith.constant 0 : index
        %45 = vector.load %arg5[%c0_31, %c0_32] : memref<8x1xf32, #tpu.memory_space<vmem>>, vector<8x1xf32>
        %c0_33 = arith.constant 0 : index
        %c0_34 = arith.constant 0 : index
        %46 = vector.load %arg7[%c0_33, %c0_34] : memref<8x1xf32, #tpu.memory_space<vmem>>, vector<8x1xf32>
        %c0_35 = arith.constant 0 : index
        %c0_36 = arith.constant 0 : index
        %47 = vector.load %arg4[%c0_35, %c0_36] : memref<8x1xf32, #tpu.memory_space<vmem>>, vector<8x1xf32>
        %48 = arith.mulf %46, %47 : vector<8x1xf32>
        %49 = arith.mulf %48, %41 : vector<8x1xf32>
        %50 = arith.subf %45, %49 : vector<8x1xf32>
        %c0_37 = arith.constant 0 : index
        %c0_38 = arith.constant 0 : index
        %51 = vector.load %arg10[%c0_37, %c0_38] : memref<8x1xf32, #tpu.memory_space<vmem>>, vector<8x1xf32>
        tpu.vector_store %arg10[%c0_37, %c0_38], %50 {strides = array<i32>} : memref<8x1xf32, #tpu.memory_space<vmem>>, vector<8x1xf32>,
      } else {
      }
      %c0_11 = arith.constant 0 : index
      %c0_12 = arith.constant 0 : index
      %16 = vector.load %arg9[%c0_11, %c0_12] : memref<8x1xf32, #tpu.memory_space<vmem>>, vector<8x1xf32>
      %c0_13 = arith.constant 0 : index
      %c0_14 = arith.constant 0 : index
      %17 = vector.load %arg10[%c0_13, %c0_14] : memref<8x1xf32, #tpu.memory_space<vmem>>, vector<8x1xf32>
      %18 = vector.broadcast %16 : vector<8x1xf32> to vector<8x256xf32>
      %19 = arith.mulf %3, %18 : vector<8x256xf32>
      %20 = vector.broadcast %17 : vector<8x1xf32> to vector<8x256xf32>
      %21 = arith.addf %19, %20 : vector<8x256xf32>
      %cst_15 = arith.constant 0.000000e+00 : f32
      %22 = vector.broadcast %cst_15 : f32 to vector<8x256xf32>
      %23 = arith.maximumf %21, %22 : vector<8x256xf32>
      %c0_16 = arith.constant 0 : index
      %c0_17 = arith.constant 0 : index
      %c0_18 = arith.constant 0 : index
      %24 = vector.load %arg6[%c0_16, %c0_17, %c0_18] : memref<2x8x256xf32, #tpu.memory_space<vmem>>, vector<1x8x256xf32>
      %25 = vector.shape_cast %24 : vector<1x8x256xf32> to vector<8x256xf32>
      %26 = vector.shape_cast %23 : vector<8x256xf32> to vector<1x8x256xf32>
      tpu.vector_store %arg6[%c0_16, %c0_17, %c0_18], %26 {strides = array<i32>} : memref<2x8x256xf32, #tpu.memory_space<vmem>>, vector<1x8x256xf32>,
      %27 = vector.broadcast %16 : vector<8x1xf32> to vector<8x256xf32>
      %28 = arith.mulf %6, %27 : vector<8x256xf32>
      %29 = vector.broadcast %17 : vector<8x1xf32> to vector<8x256xf32>
      %30 = arith.addf %28, %29 : vector<8x256xf32>
      %cst_19 = arith.constant 0.000000e+00 : f32
      %31 = vector.broadcast %cst_19 : f32 to vector<8x256xf32>
      %32 = arith.maximumf %30, %31 : vector<8x256xf32>
      %c1_20 = arith.constant 1 : index
      %c0_21 = arith.constant 0 : index
      %c0_22 = arith.constant 0 : index
      %33 = vector.load %arg6[%c1_20, %c0_21, %c0_22] : memref<2x8x256xf32, #tpu.memory_space<vmem>>, vector<1x8x256xf32>
      %34 = vector.shape_cast %33 : vector<1x8x256xf32> to vector<8x256xf32>
      %35 = vector.shape_cast %32 : vector<8x256xf32> to vector<1x8x256xf32>
      tpu.vector_store %arg6[%c1_20, %c0_21, %c0_22], %35 {strides = array<i32>} : memref<2x8x256xf32, #tpu.memory_space<vmem>>, vector<1x8x256xf32>,
    } else {
    }
    return
  }
  func.func @transform_0(%arg0: i32, %arg1: i32) -> (i32, i32, i32) {
    %c0_i32 = arith.constant 0 : i32
    %c0_i32_0 = arith.constant 0 : i32
    %c0_i32_1 = arith.constant 0 : i32
    return %arg1, %c0_i32, %c0_i32_0 : i32, i32, i32
  }
  func.func @transform_1(%arg0: i32, %arg1: i32) -> (i32, i32) {
    %c0_i32 = arith.constant 0 : i32
    %c0_i32_0 = arith.constant 0 : i32
    %c0_i32_1 = arith.constant 0 : i32
    return %c0_i32, %c0_i32_0 : i32, i32
  }
  func.func @transform_2(%arg0: i32, %arg1: i32) -> (i32, i32) {
    %c0_i32 = arith.constant 0 : i32
    %c0_i32_0 = arith.constant 0 : i32
    %c0_i32_1 = arith.constant 0 : i32
    return %c0_i32, %c0_i32_0 : i32, i32
  }
  func.func @transform_3(%arg0: i32, %arg1: i32) -> (i32, i32) {
    %c0_i32 = arith.constant 0 : i32
    %c0_i32_0 = arith.constant 0 : i32
    %c0_i32_1 = arith.constant 0 : i32
    return %c0_i32, %c0_i32_0 : i32, i32
  }
  func.func @transform_4(%arg0: i32, %arg1: i32) -> (i32, i32, i32) {
    %0 = arith.muli %arg1, %arg0 : i32
    %c0_i32 = arith.constant 0 : i32
    %c0_i32_0 = arith.constant 0 : i32
    %c0_i32_1 = arith.constant 0 : i32
    return %0, %c0_i32, %c0_i32_0 : i32, i32, i32
  }
}

</mosaic_0001>

<bundles_post_ra>
// kernel: conv_block.1
= control target key start
LH: loop header
LB: loop body
LE: loop exit
PB: predicated region body
PF: predicated region fallthrough
CT: control target
= control target key end

     0   :  { %s680_s15 = smov 0   ;;  %s682_s16 = smov 0   ;;  %s824_s0 = inlined_call_operand.vmem [shape: f32[2,36,256], index: 0, kind: input, shape index: {}]   ;;  %s825_s1 = inlined_call_operand.vmem [shape: f32[8,36], index: 1, kind: input, shape index: {}]   ;;  %s826_s2 = inlined_call_operand.vmem [shape: f32[8,1], index: 2, kind: input, shape index: {}]   ;;  %s827_s3 = inlined_call_operand.vmem [shape: f32[8,1], index: 3, kind: input, shape index: {}]   ;;  %s828_s4 = inlined_call_operand.vmem [shape: f32[2,8,256], index: 4, kind: output, shape index: {}]  }
   0x1   :  { %s684_s17 = smov 0  }
   0x2 LB: > { %s26_s18 = sadd.s32 1, %s646_s16  ;;  %p567_p0 = scmp.ge.s32.totalorder %s650_s17, 1  ;;  %s650_s17 = sphi %s684_s17, %s14_s17   ;;  %s646_s16 = sphi %s682_s16, %s830_s16   ;;  %s642_s15 = sphi %s680_s15, %s829_s15  }
   0x3   : > { %p28_p1 = scmp.ge.s32.totalorder %s26_s18, 2  ;;  %p178_p2 = scmp.lt.s32.totalorder %s650_s17, 3 }
   0x5   : > { %s832_s18 = smov (%p28_p1, %s26_s18), 0  ;;  %p179_p3 = pnand %p567_p0, %p178_p2 }
   0x6   : > { %p586_p4 = scmp.ne.s32.totalorder (!%p179_p3), %s642_s15, 0 }
   0x7   : > { %182 = sbr.rel (%p179_p3) target bundleno = 592 (0x250), region = 36 }
   0xc   : > { %vm238_vm0 = vcmask 1043456   ;;  %v580_v0 = vld [vmem:[%s824_s0 + $0x90] sm:$0xf]  ;;  %v581_v1 = vld [vmem:[%s824_s0 + $0x98] sm:$0xf]  ;;  %v578_v2 = vld [vmem:[%s824_s0 + $0x80] sm:$0xff] }
   0xd   : > { %582 = vmatpush.msk.msra.mxu2 %vm238_vm0, %v580_v0  ;;  %584 = vmatpush.msk.msra.mxu3 %vm238_vm0, %v581_v1  ;;  %v579_v3 = vld [vmem:[%s824_s0 + $0x88] sm:$0xff]  ;;  %v576_v4 = vld [vmem:[%s824_s0 + $0x70] sm:$0xff]  ;;  %v577_v5 = vld [vmem:[%s824_s0 + $0x78] sm:$0xff]  ;;  %vm234_vm1 = vcmask 293888  }
   0xe   : > { %v232_v6 = vld [vmem:[%s824_s0 + $0x40] sm:$0xf]  ;;  %v233_v7 = vld [vmem:[%s824_s0 + $0x48] sm:$0xf]  ;;  %v230_v8 = vld [vmem:[%s824_s0 + $0x30] sm:$0xff] }
   0xf   : > { %314 = vmatpush.msra.mxu2 %v578_v2  ;;  %334 = vmatpush.msra.mxu3 %v579_v3  ;;  %v231_v9 = vld [vmem:[%s824_s0 + $0x38] sm:$0xff]  ;;  %v574_v10 = vld [vmem:[%s824_s0 + $0x60] sm:$0xff]  ;;  %v575_v11 = vld [vmem:[%s824_s0 + $0x68] sm:$0xff] }
  0x10   : > { %568 = vmatpush.msk.msra.mxu0 %vm238_vm0, %v232_v6  ;;  %570 = vmatpush.msk.msra.mxu1 %vm238_vm0, %v233_v7  ;;  %v228_v12 = vld [vmem:[%s824_s0 + $0x20] sm:$0xff]  ;;  %v229_v13 = vld [vmem:[%s824_s0 + $0x28] sm:$0xff]  ;;  %v572_v14 = vld [vmem:[%s824_s0 + $0x50] sm:$0xff] }
  0x11   : > { %315 = vmatpush.msra.mxu2 %v576_v4  ;;  %335 = vmatpush.msra.mxu3 %v577_v5  ;;  %v573_v15 = vld [vmem:[%s824_s0 + $0x58] sm:$0xff]  ;;  %v223_v16 = vld [vmem:[%s825_s1] sm:$0xff]  ;;  %v226_v17 = vld [vmem:[%s824_s0 + $0x10] sm:$0xff] }
  0x12   : > { %257 = vmatpush.msra.mxu0 %v230_v8  ;;  %277 = vmatpush.msra.mxu1 %v231_v9  ;;  %v227_v18 = vld [vmem:[%s824_s0 + $0x18] sm:$0xff]  ;;  %v224_v19 = vld [vmem:[%s824_s0] sm:$0xff]  ;;  %v225_v20 = vld [vmem:[%s824_s0 + $0x8] sm:$0xff] }
  0x13   : > { %316 = vmatpush.msra.mxu2 %v574_v10  ;;  %336 = vmatpush.msra.mxu3 %v575_v11 }
  0x14   : > { %258 = vmatpush.msra.mxu0 %v228_v12  ;;  %278 = vmatpush.msra.mxu1 %v229_v13 }
  0x15   : > { %317 = vmatpush.msra.mxu2 %v572_v14  ;;  %337 = vmatpush.msra.mxu3 %v573_v15 }
  0x16   : > { %583 = vmatmul.msk.f32.vlgmr.msra.gmra.mxu2 %vm234_vm1, %v223_v16  ;;  %585 = vmatmul.msk.f32.vlgmr.msra.gmra.mxu3 %vm234_vm1, %v223_v16 }
  0x17   : > { %259 = vmatpush.msra.mxu0 %v226_v17  ;;  %279 = vmatpush.msra.mxu1 %v227_v18 }
  0x19   : > { %260 = vmatpush.msra.mxu0 %v224_v19  ;;  %280 = vmatpush.msra.mxu1 %v225_v20 }
  0x1a   : > { %569 = vmatmul.msk.f32.vlgmr.msra.gmra.mxu0 %vm234_vm1, %v223_v16  ;;  %571 = vmatmul.msk.f32.vlgmr.msra.gmra.mxu1 %vm234_vm1, %v223_v16 }
  0x95   : > { %345 = sbr.rel (%p586_p4) target bundleno = 421 (0x1a5), region = 40 }
  0x97   : > { %v771_v21 = vpop.f32.mrf.mxu0  ;;  %v773_v22 = vpop.f32.mrf.mxu1 }
  0x99   : > { %v775_v23 = vpop.f32.mrf.mxu2  ;;  %v777_v24 = vpop.f32.mrf.mxu3 }
  0x9a   : > { %v353_v25 = vadd.f32 %v773_v22, %v771_v21  ;;  %v652_v26 = vmov 512.0   ;;  %v356_v27 = vadd.f32 %v777_v24, %v775_v23  ;;  %vm350_vm3 = vcmask 7168  }
  0x9b   : > { %623 = vrcp.f32 %v652_v26  ;;  %v653_v34 = vmov 0.0  }
  0x9c   : > { %354 = vadd.xlane.f32.xlu0 %v353_v25  ;;  %351 = vst.msk [vmem:[#allocation2] sm:$0xff] %vm350_vm3, %v653_v34 }
  0x9d   : > { %352 = vst.msk [vmem:[#allocation3] sm:$0xff] %vm350_vm3, %v653_v34 }
  0xa1   : > { %v624_v28 = vpop.eup %623 }
  0xa2   : > { %v384_v29 = vmul.f32 512.0, %v624_v28  ;;  %vm389_vm2 = vweird.f32 %v624_v28 }
  0xa3   : > { %v380_v38 = vld [vmem:[#allocation2] sm:$0xff] }
  0xa4   : > { %357 = vadd.xlane.f32.xlu0 %v356_v27  ;;  %v385_v30 = vsub.f32 1.0, %v384_v29  ;;  %v404_v59 = vld [vmem:[#allocation3] sm:$0xff] }
  0xa6   : > { %v386_v31 = vmul.f32 %v624_v28, %v385_v30 }
  0xa8   : > { %v387_v32 = vadd.f32 %v624_v28, %v386_v31 }
  0xaa   : > { %v391_v33 = vsel %vm389_vm2, %v624_v28, %v387_v32 }
  0xab   : > { %594 = vpush %v391_v33 }
  0xdc   : > { %s595_s13 = spop %594 }
  0xdd   : > { %s398_s14 = smul.f32 512.0, %s595_s13 }
  0xde   : > { %s424_s19 = smul.f32 0.0, %s595_s13 }
  0xdf   : > { %v399_v40 = vstv %s398_s14 }
  0xe0   : > { %v425_v44 = vstv %s424_s19 }
 0x10f   : > { %v355_v35 = vpop.xlane.xlu0 %354 }
 0x117   : > { %v358_v36 = vpop.xlane.xlu0 %357 }
 0x118   : > { %v359_v37 = vadd.f32 %v358_v36, %v355_v35 }
 0x11a   : > { %v360_v39 = vmul.f32 0.001953125, %v359_v37 }
 0x11c   : > { %v381_v41 = vsub.f32 %v360_v39, %v380_v38  ;;  %v361_v42 = vsub.f32 %v771_v21, %v360_v39  ;;  %v362_v43 = vsub.f32 %v773_v22, %v360_v39  ;;  %v369_v49 = vsub.f32 %v775_v23, %v360_v39 }
 0x11d   : > { %v370_v53 = vsub.f32 %v777_v24, %v360_v39 }
 0x11e   : > { %v400_v45 = vmul.f32 %v399_v40, %v381_v41  ;;  %v406_v46 = vmul.f32 %v381_v41, %v381_v41  ;;  %v363_v47 = vmul.f32 %v361_v42, %v361_v42  ;;  %v364_v48 = vmul.f32 %v362_v43, %v362_v43 }
 0x11f   : > { %v371_v54 = vmul.f32 %v369_v49, %v369_v49  ;;  %v372_v55 = vmul.f32 %v370_v53, %v370_v53 }
 0x120   : > { %v401_v50 = vadd.f32 %v400_v45, %v380_v38  ;;  %v426_v51 = vmul.f32 %v425_v44, %v406_v46  ;;  %v365_v52 = vadd.f32 %v364_v48, %v363_v47 }
 0x121   : > { %v373_v56 = vadd.f32 %v372_v55, %v371_v54 }
 0x122   : > { %403 = vst.msk [vmem:[#allocation2] sm:$0xff] %vm350_vm3, %v401_v50  ;;  %366 = vadd.xlane.f32.xlu1 %v365_v52 }
 0x12a   : > { %374 = vadd.xlane.f32.xlu1 %v373_v56 }
 0x195   : > { %v367_v57 = vpop.xlane.xlu1 %366 }
 0x19d   : > { %v375_v58 = vpop.xlane.xlu1 %374 }
 0x19e   : > { %v376_v60 = vadd.f32 %v375_v58, %v367_v57 }
 0x1a0   : > { %v405_v61 = vadd.f32 %v404_v59, %v376_v60 }
 0x1a2   : > { %v427_v62 = vadd.f32 %v426_v51, %v405_v61 }
 0x1a4   : > { %428 = vst.msk [vmem:[#allocation3] sm:$0xff] %vm350_vm3, %v427_v62 }
 0x1a5 PF: > { %p587_p5 = scmp.ne.s32.totalorder %s642_s15, 1 }
 0x1a7   : > { %432 = sbr.rel (%p587_p5) target bundleno = 592 (0x250), region = 48 }
 0x1ac   : > { %v437_v63 = vld [vmem:[#allocation3] sm:$0xff]  ;;  %v654_v0 = vmov 0   ;;  %v455_v7 = vld [vmem:[#allocation2] sm:$0xff]  ;;  %vm452_vm7 = vcmask 7168  }
 0x1ad   : > { %625 = vset.pattern.permute.xlu0 %v654_v0  ;;  %v438_v1 = vmul.f32 0.001953125, %v437_v63  ;;  %v450_v9 = vld [vmem:[%s826_s2] sm:$0xff] }
 0x1ae   : > { %v457_v10 = vmul.f32 %v455_v7, %v450_v9  ;;  %v454_v13 = vld [vmem:[%s827_s3] sm:$0xff] }
 0x1af   : > { %v439_v2 = vadd.f32 1e-05, %v438_v1 }
 0x1b1   : > { %626 = vrsqrt.f32 %v439_v2  ;;  %vm446_vm4 = vweird.f32 %v439_v2 }
 0x1b7   : > { %v627_v3 = vpop.eup %626 }
 0x1b8   : > { %v441_v4 = vmul.f32 %v627_v3, %v439_v2  ;;  %vm447_vm5 = vweird.f32 %v627_v3 }
 0x1b9   : > { %vm448_vm6 = vmor %vm446_vm4, %vm447_vm5 }
 0x1ba   : > { %v442_v5 = vmul.f32 %v627_v3, %v441_v4 }
 0x1bc   : > { %v443_v6 = vmul.f32 0.5, %v442_v5 }
 0x1be   : > { %v444_v8 = vsub.f32 1.5, %v443_v6 }
 0x1c0   : > { %v445_v11 = vmul.f32 %v627_v3, %v444_v8 }
 0x1c2   : > { %v449_v12 = vsel %vm448_vm6, %v627_v3, %v445_v11 }
 0x1c3   : > { %v451_v14 = vmul.f32 %v450_v9, %v449_v12  ;;  %v458_v15 = vmul.f32 %v457_v10, %v449_v12 }
 0x1c5   : > { %453 = vst.msk [vmem:[#allocation4] sm:$0xff] %vm452_vm7, %v451_v14  ;;  %v459_v16 = vsub.f32 %v454_v13, %v458_v15 }
 0x1c7   : > { %460 = vst.msk [vmem:[#allocation5] sm:$0xff] %vm452_vm7, %v459_v16 }
 0x1cc   : > { %v461_v17 = vld [vmem:[#allocation4] sm:$0xff] }
 0x1cd   : > { %465 = vperm.xlu0 %625, %v461_v17  }
 0x1ce   : > { %v462_v18 = vld [vmem:[#allocation5] sm:$0xff] }
 0x1d5   : > { %472 = vperm.xlu0 %625, %v462_v18  }
 0x23f   : > { %v466_v19 = vpop.permute.xlu0 %465 }
 0x240   : > { %v468_v20 = vmul.f32 %v466_v19, %v771_v21  ;;  %v469_v25 = vmul.f32 %v466_v19, %v773_v22  ;;  %v481_v26 = vmul.f32 %v466_v19, %v775_v23  ;;  %v482_v27 = vmul.f32 %v466_v19, %v777_v24 }
 0x247   : > { %v473_v28 = vpop.permute.xlu0 %472 }
 0x248   : > { %v475_v29 = vadd.f32 %v473_v28, %v468_v20  ;;  %v476_v30 = vadd.f32 %v473_v28, %v469_v25  ;;  %v483_v31 = vadd.f32 %v481_v26, %v473_v28  ;;  %v484_v32 = vadd.f32 %v482_v27, %v473_v28 }
 0x24a   : > { %v477_v33 = vmax.f32 %v475_v29, 0.0  ;;  %v478_v34 = vmax.f32 %v476_v30, 0.0  ;;  %v485_v35 = vmax.f32 %v483_v31, 0.0  ;;  %v486_v36 = vmax.f32 %v484_v32, 0.0 }
 0x24c   : > { %479 = vst [vmem:[%s828_s4] sm:$0xff] %v477_v33 }
 0x24d   : > { %480 = vst [vmem:[%s828_s4 + $0x8] sm:$0xff] %v478_v34 }
 0x24e   : > { %588 = vst [vmem:[%s828_s4 + $0x10] sm:$0xff] %v485_v35 }
 0x24f   : > { %589 = vst [vmem:[%s828_s4 + $0x18] sm:$0xff] %v486_v36 }
 0x250 PF: > { %s14_s17 = sadd.s32 1, %s650_s17   ;;  %s829_s15 = smov %s646_s16 }
 0x251   : > { %p11_p6 = scmp.ge.s32.totalorder %s14_s17, 4   ;;  %s830_s16 = smov %s832_s18 }
 0x253   :  { %13 = sbr.rel (!%p11_p6) target bundleno = 2 (0x2), region = 84 }

</bundles_post_ra>
